<compile_context>
chip_gen: v7x
topology: tpu7x:2x2x1
jax: 0.10.0
libtpu: 0.0.40
codegen_flags: <defaults>
</compile_context>

<pallas_src>
import functools

import jax
import jax.numpy as jnp
from jax.experimental import pallas as pl
from jax.experimental.pallas import tpu as pltpu

L1 = 400          # hidden size of first linear (hard-coded in the module)
EPS = 1e-6        # LayerNorm eps


def _round_up(x, m):
    return ((x + m - 1) // m) * m


def _default_ln1_bf16():
    """bf16 VPU/EUP exists on v6e/v7x; keep f32 elementwise math on v5e and older."""
    try:
        kind = jax.devices()[0].device_kind.lower()
    except Exception:
        return False
    return ("v6" in kind) or ("v7" in kind)


def _layernorm_tanh(x, gamma, beta, *, compute_dtype):
    """One-pass PyTorch-style LayerNorm (std with ddof=1) followed by tanh.

    Statistics (sum, sum-of-squares, mean, var, reciprocal) are computed in f32.
    The wide normalize/scale/shift/tanh chain runs in `compute_dtype` (bf16 on
    v6e/v7x halves vreg passes on the VPU/EUP-bound work; f32 on v5e).
    `centered` is never materialized: (x - mean) is recomputed in the final
    normalize, saving a full-width store+load pass.
    """
    n = x.shape[-1]
    s1 = jnp.sum(x, axis=-1, keepdims=True)
    s2 = jnp.sum(x * x, axis=-1, keepdims=True)
    mean = s1 * (1.0 / n)
    var = jnp.maximum(s2 * (1.0 / n) - mean * mean, 0.0) * (n / (n - 1.0))
    inv = pl.reciprocal(jnp.sqrt(var) + EPS, approx=True)     # EUP slot, ~free
    d = compute_dtype
    y = (x.astype(d) - mean.astype(d)) * inv.astype(d)
    y = y * gamma.astype(d) + beta.astype(d)
    return jnp.tanh(y)


def shared_state_embedding_kernel(
    x_ref,       # [TB, state_dim]  f32  (batch tile)
    w1_ref,      # [state_dim, L1]  bf16 (or f32)
    p1_ref,      # [3, L1]          f32  rows: (b1, gamma1, beta1)
    w2_ref,      # [L1, ls]         bf16 (or f32)
    p2_ref,      # [3, ls]          f32  rows: (b2, gamma2, beta2)
    o_ref,       # [TB, ls]         f32
    *,
    ln1_dtype,
):
    mm_dtype = w1_ref.dtype  # bf16 MXU operands, f32 accumulate

    p1 = p1_ref[...]
    b1, g1, be1 = p1[0:1, :], p1[1:2, :], p1[2:3, :]
    p2 = p2_ref[...]
    b2, g2, be2 = p2[0:1, :], p2[1:2, :], p2[2:3, :]

    # ---- layer 1: linear -> layernorm -> tanh (chain in ln1_dtype) ----
    x = x_ref[...].astype(mm_dtype)
    h1 = jnp.dot(x, w1_ref[...], preferred_element_type=jnp.float32) + b1
    h1 = _layernorm_tanh(h1, g1, be1, compute_dtype=ln1_dtype)

    # ---- layer 2: linear -> layernorm -> tanh (small: ls lanes, stay f32) ----
    h2 = jnp.dot(h1.astype(mm_dtype), w2_ref[...],
                 preferred_element_type=jnp.float32) + b2
    h2 = _layernorm_tanh(h2, g2, be2, compute_dtype=jnp.float32)
    o_ref[...] = h2.astype(o_ref.dtype)


@functools.partial(jax.jit, static_argnames=("block_b", "use_bf16", "ln1_bf16"))
def _shared_state_embedding_impl(state, params, *, block_b, use_bf16, ln1_bf16):
    state = state.astype(jnp.float32)
    B, state_dim = state.shape
    ls = params["w2"].shape[1]

    # --- batch tiling ---------------------------------------------------------
    # Tile is a multiple of 8 (sublane), capped at block_b; the batch is padded to
    # a multiple of the tile.  If the whole batch would fit one tile but has >=16
    # rows, split it into two tiles so the "parallel" grid axis can be sharded
    # across both TensorCores on v7x.
    bp8 = _round_up(B, 8)
    tb = _round_up(min(block_b, bp8), 8)
    if bp8 // tb < 2 and bp8 >= 16:
        tb = _round_up((bp8 + 1) // 2, 8)
    bp = _round_up(B, tb)
    if bp != B:
        state = jnp.pad(state, ((0, bp - B), (0, 0)))
    grid = (bp // tb,)

    # --- parameter prep (once, outside the grid loop) -------------------------
    mm_dtype = jnp.bfloat16 if use_bf16 else jnp.float32
    ln1_dtype = jnp.bfloat16 if (use_bf16 and ln1_bf16) else jnp.float32
    w1 = params["w1"].astype(mm_dtype)
    w2 = params["w2"].astype(mm_dtype)
    # Stack (bias, gamma, beta) per layer -> 2 grid-invariant inputs instead of 6.
    p1 = jnp.concatenate([params["b1"], params["gamma1"], params["beta1"]], axis=0)
    p2 = jnp.concatenate([params["b2"], params["gamma2"], params["beta2"]], axis=0)

    def full(shape):                      # grid-invariant blocks, resident in VMEM
        return pl.BlockSpec(shape, lambda i: (0, 0))

    kernel = functools.partial(shared_state_embedding_kernel, ln1_dtype=ln1_dtype)

    out = pl.pallas_call(
        kernel,
        out_shape=jax.ShapeDtypeStruct((bp, ls), jnp.float32),
        grid=grid,
        in_specs=[
            pl.BlockSpec((tb, state_dim), lambda i: (i, 0)),     # streamed batch tile
            full((state_dim, L1)),
            full((3, L1)),
            full((L1, ls)),
            full((3, ls)),
        ],
        out_specs=pl.BlockSpec((tb, ls), lambda i: (i, 0)),
        compiler_params=pltpu.CompilerParams(
            dimension_semantics=("parallel",),   # shard batch tiles across TCs on v7x
        ),
    )(state, w1, p1, w2, p2)
    return out[:B]


def shared_state_embedding(state, params, *, block_b=2048, use_bf16=True, ln1_bf16=None):
    """state: [B, state_dim] f32. params: dict of f32 arrays (see init_params).

    block_b: max batch-tile rows (sweep 2048-4096 for large-batch evaluation).
    use_bf16: bf16 MXU operands (f32 accumulation).
    ln1_bf16: run the wide layer-1 LN/tanh chain in bf16; None = auto (on for
    v6e/v7x, off for v5e and older / non-TPU backends).
    """
    if ln1_bf16 is None:
        ln1_bf16 = _default_ln1_bf16()
    return _shared_state_embedding_impl(
        state, params, block_b=int(block_b),
        use_bf16=bool(use_bf16), ln1_bf16=bool(ln1_bf16))


def init_params(key, state_dim, ls):
    """Deterministic synthetic parameters (shapes follow the PyTorch module)."""
    k1, k2, k3, k4 = jax.random.split(key, 4)
    # weights stored already transposed to [in, out] for the kernel matmuls
    w1 = jax.random.normal(k1, (state_dim, L1), jnp.float32) * 0.05
    b1 = jax.random.normal(k2, (1, L1), jnp.float32) * 0.05
    w2 = jax.random.normal(k3, (L1, ls), jnp.float32) * 0.05
    b2 = jax.random.normal(k4, (1, ls), jnp.float32) * 0.05
    return {
        "w1": w1, "b1": b1,
        "gamma1": jnp.ones((1, L1), jnp.float32),
        "beta1": jnp.zeros((1, L1), jnp.float32),
        "w2": w2, "b2": b2,
        "gamma2": jnp.ones((1, ls), jnp.float32),
        "beta2": jnp.zeros((1, ls), jnp.float32),
    }


# ----------------------------- pure-JAX reference -----------------------------
def _layernorm_ref(x, gamma, beta):
    n = x.shape[-1]
    mean = jnp.mean(x, axis=-1, keepdims=True)
    centered = x - mean
    std = jnp.sqrt(jnp.sum(centered * centered, axis=-1, keepdims=True) / (n - 1))
    return gamma * centered / (std + EPS) + beta


def _reference(state, p):
    dot = functools.partial(jnp.dot, precision=jax.lax.Precision.HIGHEST)
    h = dot(state, p["w1"]) + p["b1"]
    h = jnp.tanh(_layernorm_ref(h, p["gamma1"], p["beta1"]))
    h = dot(h, p["w2"]) + p["b2"]
    return jnp.tanh(_layernorm_ref(h, p["gamma2"], p["beta2"]))


if __name__ == "__main__":
    key = jax.random.PRNGKey(0)
    kx, kx2, kp = jax.random.split(key, 3)

    state_dim, ls = 16, 32           # args.state_dim = 16, args.ls = 32, args.use_ln = True
    params = init_params(kp, state_dim, ls)

    # Tolerances: bf16 MXU operands + approx reciprocal -> ~1e-2 vs f32 torch math;
    # the bf16 LN1 chain (v6e/v7x path) adds a bit more, still well under 6e-2.
    TOL_F32_LN, TOL_BF16_LN = 2e-2, 6e-2

    # --- small batch, single/two-tile grid -------------------------------------
    state = jax.random.normal(kx, (8, state_dim), jnp.float32)
    ref = _reference(state, params)

    out_a = jax.block_until_ready(shared_state_embedding(state, params, ln1_bf16=False))
    assert out_a.shape == (8, ls)
    err_a = float(jnp.max(jnp.abs(out_a - ref)))
    assert err_a < TOL_F32_LN, f"f32-LN path mismatch (max abs err {err_a})"

    out_b = jax.block_until_ready(shared_state_embedding(state, params, ln1_bf16=True))
    err_b = float(jnp.max(jnp.abs(out_b - ref)))
    assert err_b < TOL_BF16_LN, f"bf16-LN path mismatch (max abs err {err_b})"

    # --- larger batch: multi-step grid + batch padding --------------------------
    state2 = jax.random.normal(kx2, (200, state_dim), jnp.float32)
    ref2 = _reference(state2, params)
    tol_auto = TOL_BF16_LN if _default_ln1_bf16() else TOL_F32_LN

    # explicit small tile -> 4 grid steps
    out2 = jax.block_until_ready(shared_state_embedding(state2, params, block_b=64))
    assert out2.shape == (200, ls)
    err2 = float(jnp.max(jnp.abs(out2 - ref2)))
    assert err2 < tol_auto, f"multi-tile mismatch (max abs err {err2})"

    # default tile -> auto-split into 2 tiles (v7x two-TC path)
    out3 = jax.block_until_ready(shared_state_embedding(state2, params))
    err3 = float(jnp.max(jnp.abs(out3 - ref2)))
    assert err3 < tol_auto, f"auto-split mismatch (max abs err {err3})"

    print("KERNEL_OK")
</pallas_src>

<mosaic_0001>
module attributes {stable_mosaic.version = 11 : i64} {
  func.func @shared_state_embedding_kernel(%arg0: i32, %arg1: memref<8x16xf32, #tpu.memory_space<vmem>>, %arg2: memref<16x400xbf16, #tpu.memory_space<vmem>>, %arg3: memref<3x400xf32, #tpu.memory_space<vmem>>, %arg4: memref<400x32xbf16, #tpu.memory_space<vmem>>, %arg5: memref<3x32xf32, #tpu.memory_space<vmem>>, %arg6: memref<8x32xf32, #tpu.memory_space<vmem>>) attributes {dimension_semantics = [#tpu.dimension_semantics<parallel>], iteration_bounds = array<i64: 1>, scalar_prefetch = 0 : i64, scratch_operands = 0 : i64, tpu.core_type = #tpu.core_type<tc>, window_params = [{transform_indices = @transform_0, window_bounds = array<i64: 8, 16>}, {pipeline_mode = #tpu.pipeline_mode<synchronous>, transform_indices = @transform_1, window_bounds = array<i64: 16, 400>}, {pipeline_mode = #tpu.pipeline_mode<synchronous>, transform_indices = @transform_2, window_bounds = array<i64: 3, 400>}, {pipeline_mode = #tpu.pipeline_mode<synchronous>, transform_indices = @transform_3, window_bounds = array<i64: 400, 32>}, {pipeline_mode = #tpu.pipeline_mode<synchronous>, transform_indices = @transform_4, window_bounds = array<i64: 3, 32>}, {transform_indices = @transform_5, window_bounds = array<i64: 8, 32>}]} {
    %c0 = arith.constant 0 : index
    %c0_0 = arith.constant 0 : index
    %0 = vector.load %arg3[%c0, %c0_0] : memref<3x400xf32, #tpu.memory_space<vmem>>, vector<3x400xf32>
    %1 = vector.extract_strided_slice %0 {offsets = [0, 0], sizes = [1, 400], strides = [1, 1]} : vector<3x400xf32> to vector<1x400xf32>
    %2 = vector.extract_strided_slice %0 {offsets = [1, 0], sizes = [1, 400], strides = [1, 1]} : vector<3x400xf32> to vector<1x400xf32>
    %3 = vector.extract_strided_slice %0 {offsets = [2, 0], sizes = [1, 400], strides = [1, 1]} : vector<3x400xf32> to vector<1x400xf32>
    %c0_1 = arith.constant 0 : index
    %c0_2 = arith.constant 0 : index
    %4 = vector.load %arg5[%c0_1, %c0_2] : memref<3x32xf32, #tpu.memory_space<vmem>>, vector<3x32xf32>
    %5 = vector.extract_strided_slice %4 {offsets = [0, 0], sizes = [1, 32], strides = [1, 1]} : vector<3x32xf32> to vector<1x32xf32>
    %6 = vector.extract_strided_slice %4 {offsets = [1, 0], sizes = [1, 32], strides = [1, 1]} : vector<3x32xf32> to vector<1x32xf32>
    %7 = vector.extract_strided_slice %4 {offsets = [2, 0], sizes = [1, 32], strides = [1, 1]} : vector<3x32xf32> to vector<1x32xf32>
    %c0_3 = arith.constant 0 : index
    %c0_4 = arith.constant 0 : index
    %8 = vector.load %arg1[%c0_3, %c0_4] : memref<8x16xf32, #tpu.memory_space<vmem>>, vector<8x16xf32>
    %9 = arith.truncf %8 : vector<8x16xf32> to vector<8x16xbf16>
    %c0_5 = arith.constant 0 : index
    %c0_6 = arith.constant 0 : index
    %10 = vector.load %arg2[%c0_5, %c0_6] : memref<16x400xbf16, #tpu.memory_space<vmem>>, vector<16x400xbf16>
    %cst = arith.constant dense<0.000000e+00> : vector<8x400xf32>
    %11 = tpu.matmul %9, %10, %cst {dimension_numbers = #tpu.dot_dimension_numbers<[1], [0], [0], [1], [0, 0, 1, 1], [], []>} : vector<8x16xbf16>, vector<16x400xbf16>, vector<8x400xf32> -> vector<8x400xf32>
    %12 = vector.broadcast %1 : vector<1x400xf32> to vector<8x400xf32>
    %13 = arith.addf %11, %12 : vector<8x400xf32>
    %cst_7 = arith.constant dense<0.000000e+00> : vector<8xf32>
    %14 = vector.multi_reduction <add>, %13, %cst_7 [1] : vector<8x400xf32> to vector<8xf32>
    %15 = vector.shape_cast %14 : vector<8xf32> to vector<8x1xf32>
    %16 = arith.mulf %13, %13 : vector<8x400xf32>
    %cst_8 = arith.constant dense<0.000000e+00> : vector<8xf32>
    %17 = vector.multi_reduction <add>, %16, %cst_8 [1] : vector<8x400xf32> to vector<8xf32>
    %18 = vector.shape_cast %17 : vector<8xf32> to vector<8x1xf32>
    %cst_9 = arith.constant 2.500000e-03 : f32
    %19 = vector.broadcast %cst_9 : f32 to vector<8x1xf32>
    %20 = arith.mulf %15, %19 : vector<8x1xf32>
    %cst_10 = arith.constant 2.500000e-03 : f32
    %21 = vector.broadcast %cst_10 : f32 to vector<8x1xf32>
    %22 = arith.mulf %18, %21 : vector<8x1xf32>
    %23 = arith.mulf %20, %20 : vector<8x1xf32>
    %24 = arith.subf %22, %23 : vector<8x1xf32>
    %cst_11 = arith.constant 0.000000e+00 : f32
    %25 = vector.broadcast %cst_11 : f32 to vector<8x1xf32>
    %26 = arith.maximumf %24, %25 : vector<8x1xf32>
    %cst_12 = arith.constant 1.00250626 : f32
    %27 = vector.broadcast %cst_12 : f32 to vector<8x1xf32>
    %28 = arith.mulf %26, %27 : vector<8x1xf32>
    %29 = math.sqrt %28 : vector<8x1xf32>
    %cst_13 = arith.constant 9.99999997E-7 : f32
    %30 = vector.broadcast %cst_13 : f32 to vector<8x1xf32>
    %31 = arith.addf %29, %30 : vector<8x1xf32>
    %32 = tpu.reciprocal %31 {approx = true} : vector<8x1xf32> -> vector<8x1xf32>
    %33 = vector.broadcast %20 : vector<8x1xf32> to vector<8x400xf32>
    %34 = arith.subf %13, %33 : vector<8x400xf32>
    %35 = vector.broadcast %32 : vector<8x1xf32> to vector<8x400xf32>
    %36 = arith.mulf %34, %35 : vector<8x400xf32>
    %37 = vector.broadcast %2 : vector<1x400xf32> to vector<8x400xf32>
    %38 = arith.mulf %36, %37 : vector<8x400xf32>
    %39 = vector.broadcast %3 : vector<1x400xf32> to vector<8x400xf32>
    %40 = arith.addf %38, %39 : vector<8x400xf32>
    %41 = math.tanh %40 : vector<8x400xf32>
    %42 = arith.truncf %41 : vector<8x400xf32> to vector<8x400xbf16>
    %c0_14 = arith.constant 0 : index
    %c0_15 = arith.constant 0 : index
    %43 = vector.load %arg4[%c0_14, %c0_15] : memref<400x32xbf16, #tpu.memory_space<vmem>>, vector<400x32xbf16>
    %cst_16 = arith.constant dense<0.000000e+00> : vector<8x32xf32>
    %44 = tpu.matmul %42, %43, %cst_16 {dimension_numbers = #tpu.dot_dimension_numbers<[1], [0], [0], [1], [0, 0, 1, 1], [], []>} : vector<8x400xbf16>, vector<400x32xbf16>, vector<8x32xf32> -> vector<8x32xf32>
    %45 = vector.broadcast %5 : vector<1x32xf32> to vector<8x32xf32>
    %46 = arith.addf %44, %45 : vector<8x32xf32>
    %cst_17 = arith.constant dense<0.000000e+00> : vector<8xf32>
    %47 = vector.multi_reduction <add>, %46, %cst_17 [1] : vector<8x32xf32> to vector<8xf32>
    %48 = vector.shape_cast %47 : vector<8xf32> to vector<8x1xf32>
    %49 = arith.mulf %46, %46 : vector<8x32xf32>
    %cst_18 = arith.constant dense<0.000000e+00> : vector<8xf32>
    %50 = vector.multi_reduction <add>, %49, %cst_18 [1] : vector<8x32xf32> to vector<8xf32>
    %51 = vector.shape_cast %50 : vector<8xf32> to vector<8x1xf32>
    %cst_19 = arith.constant 3.125000e-02 : f32
    %52 = vector.broadcast %cst_19 : f32 to vector<8x1xf32>
    %53 = arith.mulf %48, %52 : vector<8x1xf32>
    %cst_20 = arith.constant 3.125000e-02 : f32
    %54 = vector.broadcast %cst_20 : f32 to vector<8x1xf32>
    %55 = arith.mulf %51, %54 : vector<8x1xf32>
    %56 = arith.mulf %53, %53 : vector<8x1xf32>
    %57 = arith.subf %55, %56 : vector<8x1xf32>
    %cst_21 = arith.constant 0.000000e+00 : f32
    %58 = vector.broadcast %cst_21 : f32 to vector<8x1xf32>
    %59 = arith.maximumf %57, %58 : vector<8x1xf32>
    %cst_22 = arith.constant 1.03225803 : f32
    %60 = vector.broadcast %cst_22 : f32 to vector<8x1xf32>
    %61 = arith.mulf %59, %60 : vector<8x1xf32>
    %62 = math.sqrt %61 : vector<8x1xf32>
    %cst_23 = arith.constant 9.99999997E-7 : f32
    %63 = vector.broadcast %cst_23 : f32 to vector<8x1xf32>
    %64 = arith.addf %62, %63 : vector<8x1xf32>
    %65 = tpu.reciprocal %64 {approx = true} : vector<8x1xf32> -> vector<8x1xf32>
    %66 = vector.broadcast %53 : vector<8x1xf32> to vector<8x32xf32>
    %67 = arith.subf %46, %66 : vector<8x32xf32>
    %68 = vector.broadcast %65 : vector<8x1xf32> to vector<8x32xf32>
    %69 = arith.mulf %67, %68 : vector<8x32xf32>
    %70 = vector.broadcast %6 : vector<1x32xf32> to vector<8x32xf32>
    %71 = arith.mulf %69, %70 : vector<8x32xf32>
    %72 = vector.broadcast %7 : vector<1x32xf32> to vector<8x32xf32>
    %73 = arith.addf %71, %72 : vector<8x32xf32>
    %74 = math.tanh %73 : vector<8x32xf32>
    %c0_24 = arith.constant 0 : index
    %c0_25 = arith.constant 0 : index
    %75 = vector.load %arg6[%c0_24, %c0_25] : memref<8x32xf32, #tpu.memory_space<vmem>>, vector<8x32xf32>
    tpu.vector_store %arg6[%c0_24, %c0_25], %74 {strides = array<i32>} : memref<8x32xf32, #tpu.memory_space<vmem>>, vector<8x32xf32>,
    return
  }
  func.func @transform_0(%arg0: i32) -> (i32, i32) {
    %c0_i32 = arith.constant 0 : i32
    %c0_i32_0 = arith.constant 0 : i32
    return %arg0, %c0_i32 : i32, i32
  }
  func.func @transform_1(%arg0: i32) -> (i32, i32) {
    %c0_i32 = arith.constant 0 : i32
    %c0_i32_0 = arith.constant 0 : i32
    %c0_i32_1 = arith.constant 0 : i32
    return %c0_i32, %c0_i32_0 : i32, i32
  }
  func.func @transform_2(%arg0: i32) -> (i32, i32) {
    %c0_i32 = arith.constant 0 : i32
    %c0_i32_0 = arith.constant 0 : i32
    %c0_i32_1 = arith.constant 0 : i32
    return %c0_i32, %c0_i32_0 : i32, i32
  }
  func.func @transform_3(%arg0: i32) -> (i32, i32) {
    %c0_i32 = arith.constant 0 : i32
    %c0_i32_0 = arith.constant 0 : i32
    %c0_i32_1 = arith.constant 0 : i32
    return %c0_i32, %c0_i32_0 : i32, i32
  }
  func.func @transform_4(%arg0: i32) -> (i32, i32) {
    %c0_i32 = arith.constant 0 : i32
    %c0_i32_0 = arith.constant 0 : i32
    %c0_i32_1 = arith.constant 0 : i32
    return %c0_i32, %c0_i32_0 : i32, i32
  }
  func.func @transform_5(%arg0: i32) -> (i32, i32) {
    %c0_i32 = arith.constant 0 : i32
    %c0_i32_0 = arith.constant 0 : i32
    return %arg0, %c0_i32 : i32, i32
  }
}

</mosaic_0001>

<bundles_post_ra>
// kernel: _shared_state_embedding_impl.1
= control target key start
LH: loop header
LB: loop body
LE: loop exit
PB: predicated region body
PF: predicated region fallthrough
CT: control target
= control target key end

     0   :  { %v769_v2 = vmov 0   ;;  %vm89_vm0 = vcmask 130048   ;;  %s1006_s0 = inlined_call_operand.vmem [shape: f32[8,16], index: 0, kind: input, shape index: {}]   ;;  %s1007_s1 = inlined_call_operand.vmem [shape: bf16[16,400], index: 1, kind: input, shape index: {}]   ;;  %s1008_s2 = inlined_call_operand.vmem [shape: f32[3,400], index: 2, kind: input, shape index: {}]   ;;  %s1009_s3 = inlined_call_operand.vmem [shape: bf16[400,32], index: 3, kind: input, shape index: {}]   ;;  %s1010_s4 = inlined_call_operand.vmem [shape: f32[3,32], index: 4, kind: input, shape index: {}]   ;;  %s1011_s5 = inlined_call_operand.hbm [shape: f32[8,32], index: 5, kind: output, shape index: {}]  }
   0x1   :  { %v696_v0 = vld [vmem:[%s1007_s1 + $0x4] ss:$16 sps:$4 sm:$0xff]   ;;  %v698_v1 = vld [vmem:[%s1007_s1 + $0xc] ss:$16 sps:$4 sm:$0xff]   ;;  %125 = vmatprep.mubr.bf16.mxu0 %v769_v2  ;;  %166 = vmatprep.mubr.bf16.mxu1 %v769_v2  ;;  %v700_v3 = vld [vmem:[%s1007_s1] ss:$16 sps:$4 sm:$0xff]  }
   0x2   :  { %93 = vmatprep.subr.bf16.mxu0 %v696_v0  ;;  %v701_v4 = vld [vmem:[%s1007_s1 + $0x8] ss:$16 sps:$4 sm:$0xff]   ;;  %v25_v5 = vld [vmem:[%s1006_s0] sm:$0xff]  ;;  %134 = vmatprep.subr.bf16.mxu1 %v698_v1 }
   0x3   :  { %v26_v6 = vpack.c.bf16 %v25_v5, %v25_v5  ;;  %94 = vmatpush1.bf16.msra.mxu0 %v700_v3  ;;  %135 = vmatpush1.bf16.msra.mxu1 %v701_v4 }
   0x4   :  { %549 = vmatprep.subr.bf16.mxu1 %v769_v2 }
   0x6   :  { %644 = vmatmul.mubr.msk.bf16.vlgmr.msra.gmra.mrb[0].mxu0 %vm89_vm0, %v26_v6  ;;  %645 = vmatmul.mubr.msk.bf16.vlgmr.msra.gmra.mrb[0].mxu1 %vm89_vm0, %v26_v6 }
   0x7   :  { %10 = vsyncpa [#allocation3], 0  ;;  %v33_v7 = vlaneseq  ;;  %v829_v10 = vld [vmem:[%s1008_s2] sm:$0x77]  ;;  %v834_v11 = vld [vmem:[%s1008_s2 + $0x8] sm:$0x77] }
   0x8   :  { %v702_v45 = vld [vmem:[%s1009_s3 + $0x80] sm:$0xff]   ;;  %v705_v48 = vld [vmem:[%s1009_s3 + $0x88] sm:$0xff]   ;;  %v708_v51 = vld [vmem:[%s1009_s3 + $0x90] sm:$0xff]   ;;  %vm589_vm3 = vcmask 261120  }
   0x9   :  { %v821_v8 = vshrl.u32 %v33_v7, 7  ;;  %550 = vmatpush1.bf16.msra.mxu1 %v702_v45  ;;  %v703_v46 = vld [vmem:[%s1009_s3 + $0x40] sm:$0xff]   ;;  %v706_v49 = vld [vmem:[%s1009_s3 + $0x48] sm:$0xff]   ;;  %v709_v52 = vld [vmem:[%s1009_s3 + $0x50] sm:$0xff]  }
   0xa   :  { %551 = vmatprep.subr.bf16.mxu1 %v769_v2  ;;  %v704_v47 = vld [vmem:[%s1009_s3] sm:$0xff]   ;;  %672 = vmatprep.subr.bf16.mxu0 %v703_v46  ;;  %v707_v50 = vld [vmem:[%s1009_s3 + $0x8] sm:$0xff]   ;;  %v710_v53 = vld [vmem:[%s1009_s3 + $0x10] sm:$0xff]  }
   0xb   :  { %v824_v9 = vsub.s32 0, %v821_v8  ;;  %v39_v12 = vsub.s32 4, %v821_v8  ;;  %673 = vmatpush3.bf16.msra.mxu0 %v704_v47  ;;  %v711_v54 = vld [vmem:[%s1009_s3 + $0x98] sm:$0xff]   ;;  %v714_v57 = vld [vmem:[%s1009_s3 + $0xa0] sm:$0xff]   ;;  %v717_v60 = vld [vmem:[%s1009_s3 + $0xa8] sm:$0xff]  }
   0xc   :  { %674 = vmatprep.subr.bf16.mxu0 %v706_v49  ;;  %v712_v55 = vld [vmem:[%s1009_s3 + $0x58] sm:$0xff]   ;;  %v715_v58 = vld [vmem:[%s1009_s3 + $0x60] sm:$0xff]   ;;  %v718_v61 = vld [vmem:[%s1009_s3 + $0x68] sm:$0xff]  }
   0xd   :  { %v36_v13 = vrot.slane %v829_v10, %v824_v9  ;;  %v44_v14 = vrot.slane %v834_v11, %v824_v9  ;;  %v40_v15 = vrot.slane %v829_v10, %v39_v12  ;;  %v48_v16 = vrot.slane %v834_v11, %v39_v12  ;;  %552 = vmatpush1.bf16.msra.mxu1 %v705_v48  ;;  %v713_v56 = vld [vmem:[%s1009_s3 + $0x18] sm:$0xff]   ;;  %v716_v59 = vld [vmem:[%s1009_s3 + $0x20] sm:$0xff]   ;;  %v719_v62 = vld [vmem:[%s1009_s3 + $0x28] sm:$0xff]  }
   0xe   :  { %553 = vmatprep.subr.bf16.mxu1 %v769_v2  ;;  %v720_v63 = vld [vmem:[%s1009_s3 + $0xb0] sm:$0xff]   ;;  %v723_v3 = vld [vmem:[%s1009_s3 + $0xb8] sm:$0xff]   ;;  %v726_v6 = vld [vmem:[%s1009_s3 + $0xc0] sm:$0xff]  }
   0xf   :  { %v56_v17 = vrot.slane %v36_v13, %v824_v9  ;;  %v64_v18 = vrot.slane %v44_v14, %v824_v9  ;;  %v60_v19 = vrot.slane %v40_v15, %v824_v9  ;;  %v68_v20 = vrot.slane %v48_v16, %v824_v9  ;;  %675 = vmatpush3.bf16.msra.mxu0 %v707_v50  ;;  %v721_v0 = vld [vmem:[%s1009_s3 + $0x70] sm:$0xff]   ;;  %v724_v4 = vld [vmem:[%s1009_s3 + $0x78] sm:$0xff]  }
  0x10   :  { %676 = vmatprep.subr.bf16.mxu0 %v709_v52  ;;  %v722_v1 = vld [vmem:[%s1009_s3 + $0x30] sm:$0xff]   ;;  %v725_v5 = vld [vmem:[%s1009_s3 + $0x38] sm:$0xff]  }
  0x11   :  { %554 = vmatpush1.bf16.msra.mxu1 %v708_v51 }
  0x12   :  { %555 = vmatprep.subr.bf16.mxu1 %v769_v2 }
  0x13   :  { %677 = vmatpush3.bf16.msra.mxu0 %v710_v53 }
  0x14   :  { %678 = vmatprep.subr.bf16.mxu0 %v712_v55 }
  0x15   :  { %556 = vmatpush1.bf16.msra.mxu1 %v711_v54 }
  0x16   :  { %557 = vmatprep.subr.bf16.mxu1 %v769_v2 }
  0x17   :  { %679 = vmatpush3.bf16.msra.mxu0 %v713_v56 }
  0x18   :  { %680 = vmatprep.subr.bf16.mxu0 %v715_v58 }
  0x19   :  { %558 = vmatpush1.bf16.msra.mxu1 %v714_v57 }
  0x1a   :  { %559 = vmatprep.subr.bf16.mxu1 %v769_v2 }
  0x1b   :  { %681 = vmatpush3.bf16.msra.mxu0 %v716_v59 }
  0x1c   :  { %682 = vmatprep.subr.bf16.mxu0 %v718_v61 }
  0x1d   :  { %560 = vmatpush1.bf16.msra.mxu1 %v717_v60 }
  0x1e   :  { %561 = vmatprep.subr.bf16.mxu1 %v769_v2 }
  0x1f   :  { %683 = vmatpush3.bf16.msra.mxu0 %v719_v62 }
  0x20   :  { %684 = vmatprep.subr.bf16.mxu0 %v721_v0 }
  0x21   :  { %562 = vmatpush1.bf16.msra.mxu1 %v720_v63 }
  0x22   :  { %563 = vmatprep.subr.bf16.mxu1 %v769_v2 }
  0x23   :  { %685 = vmatpush3.bf16.msra.mxu0 %v722_v1 }
  0x24   :  { %686 = vmatprep.subr.bf16.mxu0 %v724_v4 }
  0x25   :  { %564 = vmatpush1.bf16.msra.mxu1 %v723_v3  ;;  %v24_v3 = vld [vmem:[%s1010_s4] sm:$0x7]  ;;  %s770_s4 = smov [#allocation2]  }
  0x26   :  { %565 = vmatprep.subr.bf16.mxu1 %v769_v2  ;;  %v220_v2 = vsub.s32 5, %v821_v8  ;;  %s632_s27 = sshll.u32 %s770_s4, 4  ;;  %s633_s27 = int_to_ptr.vmem [resolvable:$true] %s632_s27 }
  0x27   :  { %687 = vmatpush3.bf16.msra.mxu0 %v725_v5  ;;  %v355_v5 = vrot.slane %v24_v3, %v824_v9  ;;  %s745_s1 = scalar_lea.vmem %s633_s27, 128  ;;  %p750_p1 = scmp.lt.s32.totalorder %s633_s27, %s633_s27 }
  0x28   :  { %p746_p0 = scmp.ne.s32.totalorder %s633_s27, %s745_s1  ;;  %p751_p2 = scmp.lt.s32.totalorder %s745_s1, %s745_s1 }
  0x29   :  { %566 = vmatpush1.bf16.msra.mxu1 %v726_v6 }
  0x2a   :  { %p752_p3 = por %p751_p2, %p750_p1 }
  0x2c   :  { %p753_p4 = pnand %p752_p3, %p746_p0 }
  0xd9   :  { %v127_v21 = vpop.f32.mrb[0].mxu0  ;;  %v168_v22 = vpop.f32.mrb[0].mxu1 }
  0xda   :  { %v847_v23 = vadd.f32 %v127_v21, %v56_v17  ;;  %v849_v24 = vadd.f32 %v168_v22, %v64_v18  ;;  %v129_v25 = vpop.f32.mrb[1].mxu0  ;;  %v170_v26 = vpop.f32.mrb[1].mxu1 }
  0xdb   :  { %v851_v27 = vadd.f32 %v129_v25, %v60_v19  ;;  %v853_v28 = vadd.f32 %v170_v26, %v68_v20  ;;  %v131_v29 = vpop.f32.mrb[2].mxu0  ;;  %v172_v30 = vpop.f32.mrb[2].mxu1 }
  0xdc   :  { %v181_v31 = vmul.f32 %v847_v23, %v847_v23  ;;  %v132_v32 = vpop.f32.mrb[3].mxu0  ;;  %v173_v33 = vpop.f32.mrb[3].mxu1  ;;  %v183_v34 = vmul.f32 %v849_v24, %v849_v24  ;;  %v954_v29 = vsub.s32 1, %v821_v8  ;;  %v957_v30 = vsub.s32 2, %v821_v8 }
  0xdd   :  { %v182_v35 = vmul.f32 %v851_v27, %v851_v27  ;;  %v175_v36 = vadd.f32 %v851_v27, %v847_v23  ;;  %v177_v37 = vsel %vm89_vm0, %v853_v28, 0.0  ;;  %v184_v38 = vmul.f32 %v853_v28, %v853_v28 }
  0xde   :  { %v221_v32 = vrot.slane %v829_v10, %v220_v2  ;;  %v229_v33 = vrot.slane %v834_v11, %v220_v2 }
  0xdf   :  { %v176_v39 = vadd.f32 %v175_v36, %v849_v24  ;;  %v185_v40 = vadd.f32 %v182_v35, %v181_v31  ;;  %v187_v43 = vsel %vm89_vm0, %v184_v38, 0.0  ;;  %v260_v31 = vsub.s32 6, %v821_v8 }
  0xe0   :  { %v225_v35 = vrot.slane %v834_v11, %v954_v29  ;;  %v257_v38 = vrot.slane %v829_v10, %v957_v30  ;;  %v249_v8 = vrot.slane %v229_v33, %v954_v29 }
  0xe1   :  { %v178_v41 = vadd.f32 %v177_v37, %v176_v39  ;;  %v186_v42 = vadd.f32 %v185_v40, %v183_v34  ;;  %v217_v34 = vrot.slane %v829_v10, %v954_v29  ;;  %v261_v36 = vrot.slane %v829_v10, %v260_v31 }
  0xe2   :  { %v269_v37 = vrot.slane %v834_v11, %v260_v31  ;;  %v241_v39 = vrot.slane %v221_v32, %v954_v29  ;;  %v277_v49 = vrot.slane %v257_v38, %v957_v30 }
  0xe3   :  { %179 = vadd.xlane.f32.xlu0 %v178_v41  ;;  %v188_v44 = vadd.f32 %v187_v43, %v186_v42  ;;  %v237_v40 = vrot.slane %v217_v34, %v954_v29  ;;  %v245_v41 = vrot.slane %v225_v35, %v954_v29  ;;  %v265_v42 = vrot.slane %v834_v11, %v957_v30 }
  0xe4   :  { %v281_v47 = vrot.slane %v261_v36, %v957_v30  ;;  %v289_v48 = vrot.slane %v269_v37, %v957_v30 }
  0xe5   :  { %v285_v11 = vrot.slane %v265_v42, %v957_v30 }
  0xe7   :  { %189 = vadd.xlane.f32.xlu0 %v188_v44 }
 0x170   :  { %v180_v7 = vpop.xlane.xlu0 %179 }
 0x171   :  { %v191_v12 = vmul.f32 0.0025, %v180_v7 }
 0x173   :  { %v193_v14 = vmul.f32 %v191_v12, %v191_v12  ;;  %v206_v43 = vsub.f32 %v847_v23, %v191_v12  ;;  %v207_v44 = vsub.f32 %v851_v27, %v191_v12  ;;  %v208_v45 = vsub.f32 %v849_v24, %v191_v12 }
 0x174   :  { %v190_v13 = vpop.xlane.xlu0 %189  ;;  %v209_v46 = vsub.f32 %v853_v28, %v191_v12 }
 0x175   :  { %v192_v15 = vmul.f32 0.0025, %v190_v13 }
 0x177   :  { %v194_v16 = vsub.f32 %v192_v15, %v193_v14 }
 0x179   :  { %v195_v17 = vmax.f32 %v194_v16, 0.0 }
 0x17b   :  { %v196_v18 = vmul.f32 1.0025063, %v195_v17 }
 0x17d   :  { %727 = vrsqrt.f32 %v196_v18  ;;  %vm199_vm1 = vcmp.eq.f32.partialorder %v196_v18, inf  ;;  %v202_v21 = vand.u32 2147483648, %v196_v18  ;;  %vm201_vm2 = vcmp.eq.f32.partialorder %v196_v18, 0.0 }
 0x187   :  { %v728_v19 = vpop.eup %727 }
 0x188   :  { %v198_v20 = vmul.f32 %v728_v19, %v196_v18 }
 0x18a   :  { %v200_v22 = vsel %vm199_vm1, %v196_v18, %v198_v20 }
 0x18b   :  { %v203_v25 = vsel %vm201_vm2, %v202_v21, %v200_v22 }
 0x18c   :  { %v204_v26 = vadd.f32 1e-06, %v203_v25 }
 0x18e   :  { %729 = vrcp.f32 %v204_v26 }
 0x198   :  { %v730_v10 = vpop.eup %729 }
 0x199   :  { %v211_v50 = vmul.f32 %v730_v10, %v207_v44  ;;  %v213_v51 = vmul.f32 %v730_v10, %v209_v46  ;;  %v210_v52 = vmul.f32 %v730_v10, %v206_v43  ;;  %v212_v53 = vmul.f32 %v730_v10, %v208_v45 }
 0x19a   :  { %v622_v43 = vrot.slane %v24_v3, %v957_v30 }
 0x19b   :  { %v251_v23 = vmul.f32 %v241_v39, %v211_v50  ;;  %v253_v54 = vmul.f32 %v249_v8, %v213_v51  ;;  %v250_v27 = vmul.f32 %v237_v40, %v210_v52  ;;  %v252_v55 = vmul.f32 %v245_v41, %v212_v53 }
 0x19c   :  { %v617_v40 = vrot.slane %v24_v3, %v954_v29 }
 0x19d   :  { %v291_v24 = vadd.f32 %v281_v47, %v251_v23  ;;  %v293_v56 = vadd.f32 %v289_v48, %v253_v54  ;;  %v290_v28 = vadd.f32 %v277_v49, %v250_v27  ;;  %v292_v57 = vadd.f32 %v285_v11, %v252_v55 }
 0x19f   :  { %731 = vtanh.f32 %v291_v24 }
 0x1a0   :  { %733 = vtanh.f32 %v293_v56 }
 0x1a1   :  { %735 = vtanh.f32 %v290_v28 }
 0x1a2   :  { %737 = vtanh.f32 %v292_v57 }
 0x1a9   :  { %v732_v58 = vpop.eup %731 }
 0x1aa   :  { %v734_v59 = vpop.eup %733  ;;  %v299_v60 = vpack.c.bf16 %v732_v58, %v732_v58 }
 0x1ab   :  { %v736_v61 = vpop.eup %735  ;;  %v301_v62 = vpack.c.bf16 %v734_v59, %v734_v59 }
 0x1ac   :  { %v738_v63 = vpop.eup %737  ;;  %541 = vmatprep.mubr.bf16.mxu0 %v299_v60  ;;  %v298_v0 = vpack.c.bf16 %v736_v61, %v736_v61 }
 0x1ad   :  { %671 = vmatprep.mubr.msk.bf16.mxu1 %vm89_vm0, %v301_v62  ;;  %v300_v1 = vpack.c.bf16 %v738_v63, %v738_v63 }
 0x1ae   :  { %542 = vmatmul.mubr.bf16.vlgmr.msra.gmra.mrb[4].mxu0 %v298_v0 }
 0x1af   :  { %582 = vmatmul.mubr.bf16.vlgmr.msra.gmra.mrb[4].mxu1 %v300_v1 }
 0x281   :  { %v688_v4 = vpop.f32.mrb[4].mxu0 }
 0x282   :  { %v583_v6 = vpop.f32.mrb[4].mxu1  ;;  %v689_v7 = vpop.f32.mrb[5].mxu0 }
 0x283   :  { %v690_v12 = vadd.f32 %v689_v7, %v688_v4  ;;  %v585_v13 = vpop.f32.mrb[5].mxu1  ;;  %v691_v14 = vpop.f32.mrb[6].mxu0 }
 0x284   :  { %v586_v15 = vpop.f32.mrb[6].mxu1  ;;  %v692_v16 = vpop.f32.mrb[7].mxu0 }
 0x285   :  { %v544_v17 = vadd.f32 %v690_v12, %v355_v5  ;;  %v587_v18 = vpop.f32.mrb[7].mxu1 }
 0x287   :  { %v584_v19 = vadd.f32 %v583_v6, %v544_v17 }
 0x289   :  { %v590_v20 = vsel %vm589_vm3, %v584_v19, 0.0  ;;  %v593_v21 = vmul.f32 %v584_v19, %v584_v19 }
 0x28a   :  { %591 = vadd.xlane.f32.xlu1 %v590_v20 }
 0x28b   :  { %v594_v22 = vsel %vm589_vm3, %v593_v21, 0.0 }
 0x28e   :  { %595 = vadd.xlane.f32.xlu1 %v594_v22 }
 0x317   :  { %v592_v25 = vpop.xlane.xlu1 %591 }
 0x318   :  { %v597_v9 = vmul.f32 0.03125, %v592_v25 }
 0x31a   :  { %v599_v2 = vmul.f32 %v597_v9, %v597_v9  ;;  %v612_v41 = vsub.f32 %v584_v19, %v597_v9 }
 0x31b   :  { %v596_v26 = vpop.xlane.xlu1 %595 }
 0x31c   :  { %v598_v31 = vmul.f32 0.03125, %v596_v26 }
 0x31e   :  { %v600_v32 = vsub.f32 %v598_v31, %v599_v2 }
 0x320   :  { %v601_v33 = vmax.f32 %v600_v32, 0.0 }
 0x322   :  { %v602_v34 = vmul.f32 1.032258, %v601_v33 }
 0x324   :  { %739 = vrsqrt.f32 %v602_v34  ;;  %vm605_vm4 = vcmp.eq.f32.partialorder %v602_v34, inf  ;;  %v608_v37 = vand.u32 2147483648, %v602_v34  ;;  %vm607_vm5 = vcmp.eq.f32.partialorder %v602_v34, 0.0 }
 0x32e   :  { %v740_v35 = vpop.eup %739 }
 0x32f   :  { %v604_v36 = vmul.f32 %v740_v35, %v602_v34 }
 0x331   :  { %v606_v38 = vsel %vm605_vm4, %v602_v34, %v604_v36 }
 0x332   :  { %v609_v39 = vsel %vm607_vm5, %v608_v37, %v606_v38 }
 0x333   :  { %v610_v8 = vadd.f32 1e-06, %v609_v39 }
 0x335   :  { %741 = vrcp.f32 %v610_v8 }
 0x33f   :  { %v742_v42 = vpop.eup %741 }
 0x340   :  { %v613_v44 = vmul.f32 %v742_v42, %v612_v41 }
 0x342   :  { %v618_v45 = vmul.f32 %v617_v40, %v613_v44 }
 0x344   :  { %v623_v46 = vadd.f32 %v622_v43, %v618_v45 }
 0x346   :  { %743 = vtanh.f32 %v623_v46 }
 0x350   :  { %v744_v10 = vpop.eup %743 }
 0x351   :  { %625 = vst.msk [vmem:[#allocation2] sm:$0xff] %vm589_vm3, %v744_v10 }
 0x352   :  { %756 = shalt.err (!%p753_p4)
}
 0x353   :  { %s757_s29 = scalar_lea.hbm %s1011_s5, 128 }
 0x354   :  { %p758_p5 = scmp.ne.s32.totalorder %s1011_s5, %s757_s29  ;;  %p761_p6 = scmp.lt.u32.totalorder %s757_s29, %s1011_s5 }
 0x356   :  { %p763_p7 = pnand %p761_p6, %p758_p5 }
 0x358   :  { %766 = shalt.err (!%p763_p7)
}
 0x359   :  { %635 = dma.vmem_to_hbm [thread:$0]  %s633_s27, 128, %s1011_s5, [#allocation3]  }
 0x35a   :  { %767 = dma.done.wait [#allocation3], 128  }
 0x35b   :  { %768 = vsyncadd [#allocation3], 4294967168 }
 0x35c   :  { %639 = vsyncpa [#allocation3], 1 }

</bundles_post_ra>
